<compile_context>
chip_gen: v6e
topology: v6e:2x2x1
jax: 0.10.0
libtpu: 0.0.40
codegen_flags: <defaults>
</compile_context>

<pallas_src>
import functools

import jax
import jax.numpy as jnp
from jax.experimental import pallas as pl
from jax.experimental.pallas import tpu as pltpu


def _round_up(n, m):
    return ((n + m - 1) // m) * m


def _round_down(n, m):
    return (n // m) * m


def _make_mlp_kernel(num_layers: int):
    """Kernel for a fixed number of hidden layers.

    Ref order: x, (w1, b1), ..., (wN, bN), w_out, b_out, o_ref
      x:     (TILE_B, D)       batch rows as stored in HBM (no host transpose)
      w_i:   (H_out, H_in)     PyTorch-native layout (hidden ones may be bf16)
      b_i:   (H_out, 1)        f32
      w_out: (H, 1)            f32, already scaled by 2.0 (Y2 fold)
      b_out: (1, 1)            f32, already 2*b - 4.5     (Y2 fold)
      o:     (1, TILE_B)       lane-dense output row
    """

    def kernel(*refs):
        x_ref = refs[0]
        o_ref = refs[-1]
        p = refs[1:-1]

        # Layer 1: fold the x transpose into the MXU (contract both on D),
        # producing feature-major activations (H, TILE_B): batch on lanes.
        w0 = p[0][...]                               # (H, D)
        b0 = p[1][...]                               # (H, 1) f32
        x = x_ref[...]                               # (TILE_B, D)
        acc = jax.lax.dot_general(
            w0, x.astype(w0.dtype),
            dimension_numbers=(((1,), (1,)), ((), ())),
            preferred_element_type=jnp.float32)      # (H, TILE_B)
        h = jnp.maximum(acc + b0, 0.0)               # bias + ReLU in f32

        # Remaining hidden layers: Linear -> ReLU (Dropout == identity @ eval).
        for layer in range(1, num_layers):
            w = p[2 * layer][...]                    # (H, H)
            b = p[2 * layer + 1][...]                # (H, 1) f32
            acc = jnp.dot(w, h.astype(w.dtype),
                          preferred_element_type=jnp.float32)
            h = jnp.maximum(acc + b, 0.0)

        # Output head (Y2 affine pre-folded into wo/bo):
        # VPU multiply + XLU sublane reduce -> lane-dense (1, TILE_B) row.
        wo = p[2 * num_layers][...]                  # (H, 1) f32
        bo = p[2 * num_layers + 1][...]              # (1, 1) f32
        y = jnp.sum(h * wo, axis=0, keepdims=True) + bo
        o_ref[...] = y.astype(o_ref.dtype)

    return kernel


@functools.partial(jax.jit, static_argnames=("num_layers", "compute_dtype"))
def feedforward_pallas(x, params, *, num_layers, compute_dtype=jnp.float32):
    """x: (B, input_size) f32.  params: flat tuple (w1, b1, ..., wo, bo).

    Returns shape (B,) — matches `-4.5 + 2.0 * self.out(h)[:, 0]`.
    """
    B, D = x.shape
    params = list(params)
    hidden = params[0].shape[0]

    # Fold Y2_f(y) = -4.5 + 2.0*y into the output head (tiny, one-time).
    params[-2] = 2.0 * params[-2]
    params[-1] = 2.0 * params[-1] - 4.5

    # Cast hidden-layer matmul weights to the MXU compute dtype once on the
    # host (removes per-grid-step astype work); epilogue stays f32.
    if compute_dtype != jnp.float32:
        for i in range(num_layers):
            params[2 * i] = params[2 * i].astype(compute_dtype)

    # ---- batch tiling: VMEM-derived tile, lane-dense (multiple of 128) ----
    b128 = _round_up(B, 128)            # lane-dense output needs >= 128 cols
    lane_d = _round_up(D, 128)          # x tile's lane padding in VMEM
    per_col_bytes = (2 * lane_d * 4                     # x tile, double-buffered
                     + 2 * 8 * 4                        # (1, tile_b) out tile
                     + 4 * _round_up(hidden, 8) * 4)    # live f32 activations
    batch_budget = 24 * 2 ** 20         # batch-dependent VMEM budget (v7x-safe)
    tile_b = min(b128, 8192,
                 max(128, _round_down(batch_budget // per_col_bytes, 128)))
    # Ensure >= 2 grid steps when possible so the "parallel" batch axis can
    # split across v7x's two TensorCores (harmless extra step on 1-TC parts).
    if b128 >= 256 and tile_b > b128 // 2:
        tile_b = max(128, _round_down(b128 // 2, 128))
    grid_b = pl.cdiv(B, tile_b)
    out_w = grid_b * tile_b             # all output writes in-bounds, lane-dense

    # Advisory cost estimate for XLA scheduling around the custom call.
    flops = 2 * out_w * (D * hidden
                         + (num_layers - 1) * hidden * hidden
                         + hidden)
    param_bytes = sum(int(p.size) * p.dtype.itemsize for p in params)
    bytes_accessed = (int(x.size) * x.dtype.itemsize
                      + param_bytes
                      + out_w * 4)
    cost = pl.CostEstimate(flops=flops, transcendentals=0,
                           bytes_accessed=bytes_accessed)

    # VMEM budget: resident (layout-padded) params + batch-dependent buffers.
    # Clamped to 48 MiB -- below v7x's 64 MiB physical VMEM per TensorCore.
    param_vmem = sum(_round_up(p.shape[0], 8) * _round_up(p.shape[1], 128)
                     * p.dtype.itemsize for p in params)
    est = param_vmem + per_col_bytes * tile_b
    vmem_limit = int(min(48 * 2 ** 20, max(32 * 2 ** 20, 2 * est)))

    # x is tiled straight from HBM (no transpose/pad pass); the trailing
    # partial batch tile is handled by the grid, garbage columns discarded.
    x_spec = pl.BlockSpec((tile_b, D), lambda i: (i, 0))
    # Weights/biases: full-shape blocks, constant index -> VMEM-resident
    # across the batch grid (no re-DMA per step).
    param_specs = [pl.BlockSpec(p.shape, lambda i: (0, 0)) for p in params]
    out_spec = pl.BlockSpec((1, tile_b), lambda i: (0, i))

    out = pl.pallas_call(
        _make_mlp_kernel(num_layers),
        out_shape=jax.ShapeDtypeStruct((1, out_w), jnp.float32),
        grid=(grid_b,),
        in_specs=[x_spec] + param_specs,
        out_specs=out_spec,
        compiler_params=pltpu.CompilerParams(
            dimension_semantics=("parallel",),
            vmem_limit_bytes=vmem_limit),
        cost_estimate=cost,
    )(x, *params)

    return out[0, :B]


def init_params(key, input_size, hidden_size, num_layers):
    """Mimics torch.nn.Linear init: U(-1/sqrt(fan_in), +1/sqrt(fan_in)).

    Hidden weights stored PyTorch-style (out_features, in_features); biases as
    (out_features, 1) columns.  The output head weight is stored as a
    (hidden, 1) column (transpose of PyTorch's (1, hidden)) so the kernel's
    lane-reduction head can use it directly.
    """
    params = []
    dims = [input_size] + [hidden_size] * num_layers
    for i in range(num_layers):
        fan_in, fan_out = dims[i], dims[i + 1]
        key, kw, kb = jax.random.split(key, 3)
        bound = 1.0 / (fan_in ** 0.5)
        w = jax.random.uniform(kw, (fan_out, fan_in), jnp.float32, -bound, bound)
        b = jax.random.uniform(kb, (fan_out, 1), jnp.float32, -bound, bound)
        params += [w, b]
    key, kw, kb = jax.random.split(key, 3)
    bound = 1.0 / (hidden_size ** 0.5)
    wo = jax.random.uniform(kw, (hidden_size, 1), jnp.float32, -bound, bound)
    bo = jax.random.uniform(kb, (1, 1), jnp.float32, -bound, bound)
    params += [wo, bo]
    return tuple(params)


def reference_forward(x, params, num_layers):
    """Pure-JAX reference for correctness checking (un-folded Y2)."""
    h = x
    for i in range(num_layers):
        w, b = params[2 * i], params[2 * i + 1]
        h = jnp.maximum(h @ w.T + b[:, 0], 0.0)
    wo, bo = params[2 * num_layers], params[2 * num_layers + 1]
    y1 = (h @ wo)[:, 0] + bo[0, 0]
    return -4.5 + 2.0 * y1


if __name__ == "__main__":
    batch = 10          # deliberately not a multiple of 8/128: exercises the
                        # partial trailing batch tile (no host-side padding)
    input_size = 16
    hidden_size = 32
    num_layers = 3

    key = jax.random.PRNGKey(0)
    key, kx, kp = jax.random.split(key, 3)
    x = jax.random.normal(kx, (batch, input_size), jnp.float32)
    params = init_params(kp, input_size, hidden_size, num_layers)

    y = feedforward_pallas(x, params, num_layers=num_layers)
    jax.block_until_ready(y)

    y_ref = reference_forward(x, params, num_layers)
    assert y.shape == (batch,)
    assert jnp.allclose(y, y_ref, atol=1e-4, rtol=1e-4), (y, y_ref)

    print("KERNEL_OK")
</pallas_src>

<mosaic_0001>
module attributes {stable_mosaic.version = 11 : i64} {
  func.func @kernel(%arg0: i32, %arg1: memref<128x16xf32, #tpu.memory_space<vmem>>, %arg2: memref<32x16xf32, #tpu.memory_space<vmem>>, %arg3: memref<32x1xf32, #tpu.memory_space<vmem>>, %arg4: memref<32x32xf32, #tpu.memory_space<vmem>>, %arg5: memref<32x1xf32, #tpu.memory_space<vmem>>, %arg6: memref<32x32xf32, #tpu.memory_space<vmem>>, %arg7: memref<32x1xf32, #tpu.memory_space<vmem>>, %arg8: memref<32x1xf32, #tpu.memory_space<vmem>>, %arg9: memref<1x1xf32, #tpu.memory_space<vmem>>, %arg10: memref<1x128xf32, #tpu.memory_space<vmem>>) attributes {dimension_semantics = [#tpu.dimension_semantics<parallel>], iteration_bounds = array<i64: 1>, scalar_prefetch = 0 : i64, scratch_operands = 0 : i64, tpu.core_type = #tpu.core_type<tc>, window_params = [{transform_indices = @transform_0, window_bounds = array<i64: 128, 16>}, {pipeline_mode = #tpu.pipeline_mode<synchronous>, transform_indices = @transform_1, window_bounds = array<i64: 32, 16>}, {pipeline_mode = #tpu.pipeline_mode<synchronous>, transform_indices = @transform_2, window_bounds = array<i64: 32, 1>}, {pipeline_mode = #tpu.pipeline_mode<synchronous>, transform_indices = @transform_3, window_bounds = array<i64: 32, 32>}, {pipeline_mode = #tpu.pipeline_mode<synchronous>, transform_indices = @transform_4, window_bounds = array<i64: 32, 1>}, {pipeline_mode = #tpu.pipeline_mode<synchronous>, transform_indices = @transform_5, window_bounds = array<i64: 32, 32>}, {pipeline_mode = #tpu.pipeline_mode<synchronous>, transform_indices = @transform_6, window_bounds = array<i64: 32, 1>}, {pipeline_mode = #tpu.pipeline_mode<synchronous>, transform_indices = @transform_7, window_bounds = array<i64: 32, 1>}, {pipeline_mode = #tpu.pipeline_mode<synchronous>, transform_indices = @transform_8, window_bounds = array<i64: 1, 1>}, {transform_indices = @transform_9, window_bounds = array<i64: 1, 128>}]} {
    %c0 = arith.constant 0 : index
    %c0_0 = arith.constant 0 : index
    %0 = vector.load %arg2[%c0, %c0_0] : memref<32x16xf32, #tpu.memory_space<vmem>>, vector<32x16xf32>
    %c0_1 = arith.constant 0 : index
    %c0_2 = arith.constant 0 : index
    %1 = vector.load %arg3[%c0_1, %c0_2] : memref<32x1xf32, #tpu.memory_space<vmem>>, vector<32x1xf32>
    %c0_3 = arith.constant 0 : index
    %c0_4 = arith.constant 0 : index
    %2 = vector.load %arg1[%c0_3, %c0_4] : memref<128x16xf32, #tpu.memory_space<vmem>>, vector<128x16xf32>
    %cst = arith.constant dense<0.000000e+00> : vector<32x128xf32>
    %3 = tpu.matmul %0, %2, %cst {dimension_numbers = #tpu.dot_dimension_numbers<[1], [1], [0], [0], [0, 0, 1, 0], [], []>} : vector<32x16xf32>, vector<128x16xf32>, vector<32x128xf32> -> vector<32x128xf32>
    %4 = vector.broadcast %1 : vector<32x1xf32> to vector<32x128xf32>
    %5 = arith.addf %3, %4 : vector<32x128xf32>
    %cst_5 = arith.constant 0.000000e+00 : f32
    %6 = vector.broadcast %cst_5 : f32 to vector<32x128xf32>
    %7 = arith.maximumf %5, %6 : vector<32x128xf32>
    %c0_6 = arith.constant 0 : index
    %c0_7 = arith.constant 0 : index
    %8 = vector.load %arg4[%c0_6, %c0_7] : memref<32x32xf32, #tpu.memory_space<vmem>>, vector<32x32xf32>
    %c0_8 = arith.constant 0 : index
    %c0_9 = arith.constant 0 : index
    %9 = vector.load %arg5[%c0_8, %c0_9] : memref<32x1xf32, #tpu.memory_space<vmem>>, vector<32x1xf32>
    %cst_10 = arith.constant dense<0.000000e+00> : vector<32x128xf32>
    %10 = tpu.matmul %8, %7, %cst_10 {dimension_numbers = #tpu.dot_dimension_numbers<[1], [0], [0], [1], [0, 0, 1, 1], [], []>} : vector<32x32xf32>, vector<32x128xf32>, vector<32x128xf32> -> vector<32x128xf32>
    %11 = vector.broadcast %9 : vector<32x1xf32> to vector<32x128xf32>
    %12 = arith.addf %10, %11 : vector<32x128xf32>
    %cst_11 = arith.constant 0.000000e+00 : f32
    %13 = vector.broadcast %cst_11 : f32 to vector<32x128xf32>
    %14 = arith.maximumf %12, %13 : vector<32x128xf32>
    %c0_12 = arith.constant 0 : index
    %c0_13 = arith.constant 0 : index
    %15 = vector.load %arg6[%c0_12, %c0_13] : memref<32x32xf32, #tpu.memory_space<vmem>>, vector<32x32xf32>
    %c0_14 = arith.constant 0 : index
    %c0_15 = arith.constant 0 : index
    %16 = vector.load %arg7[%c0_14, %c0_15] : memref<32x1xf32, #tpu.memory_space<vmem>>, vector<32x1xf32>
    %cst_16 = arith.constant dense<0.000000e+00> : vector<32x128xf32>
    %17 = tpu.matmul %15, %14, %cst_16 {dimension_numbers = #tpu.dot_dimension_numbers<[1], [0], [0], [1], [0, 0, 1, 1], [], []>} : vector<32x32xf32>, vector<32x128xf32>, vector<32x128xf32> -> vector<32x128xf32>
    %18 = vector.broadcast %16 : vector<32x1xf32> to vector<32x128xf32>
    %19 = arith.addf %17, %18 : vector<32x128xf32>
    %cst_17 = arith.constant 0.000000e+00 : f32
    %20 = vector.broadcast %cst_17 : f32 to vector<32x128xf32>
    %21 = arith.maximumf %19, %20 : vector<32x128xf32>
    %c0_18 = arith.constant 0 : index
    %c0_19 = arith.constant 0 : index
    %22 = vector.load %arg8[%c0_18, %c0_19] : memref<32x1xf32, #tpu.memory_space<vmem>>, vector<32x1xf32>
    %c0_20 = arith.constant 0 : index
    %c0_21 = arith.constant 0 : index
    %23 = vector.load %arg9[%c0_20, %c0_21] : memref<1x1xf32, #tpu.memory_space<vmem>>, vector<1x1xf32>
    %24 = vector.broadcast %22 : vector<32x1xf32> to vector<32x128xf32>
    %25 = arith.mulf %21, %24 : vector<32x128xf32>
    %cst_22 = arith.constant dense<0.000000e+00> : vector<128xf32>
    %26 = vector.multi_reduction <add>, %25, %cst_22 [0] : vector<32x128xf32> to vector<128xf32>
    %27 = vector.shape_cast %26 : vector<128xf32> to vector<1x128xf32>
    %28 = vector.broadcast %23 : vector<1x1xf32> to vector<1x128xf32>
    %29 = arith.addf %27, %28 : vector<1x128xf32>
    %c0_23 = arith.constant 0 : index
    %c0_24 = arith.constant 0 : index
    %30 = vector.load %arg10[%c0_23, %c0_24] : memref<1x128xf32, #tpu.memory_space<vmem>>, vector<1x128xf32>
    tpu.vector_store %arg10[%c0_23, %c0_24], %29 {strides = array<i32>} : memref<1x128xf32, #tpu.memory_space<vmem>>, vector<1x128xf32>,
    return
  }
  func.func @transform_0(%arg0: i32) -> (i32, i32) {
    %c0_i32 = arith.constant 0 : i32
    %c0_i32_0 = arith.constant 0 : i32
    return %arg0, %c0_i32 : i32, i32
  }
  func.func @transform_1(%arg0: i32) -> (i32, i32) {
    %c0_i32 = arith.constant 0 : i32
    %c0_i32_0 = arith.constant 0 : i32
    %c0_i32_1 = arith.constant 0 : i32
    return %c0_i32, %c0_i32_0 : i32, i32
  }
  func.func @transform_2(%arg0: i32) -> (i32, i32) {
    %c0_i32 = arith.constant 0 : i32
    %c0_i32_0 = arith.constant 0 : i32
    %c0_i32_1 = arith.constant 0 : i32
    return %c0_i32, %c0_i32_0 : i32, i32
  }
  func.func @transform_3(%arg0: i32) -> (i32, i32) {
    %c0_i32 = arith.constant 0 : i32
    %c0_i32_0 = arith.constant 0 : i32
    %c0_i32_1 = arith.constant 0 : i32
    return %c0_i32, %c0_i32_0 : i32, i32
  }
  func.func @transform_4(%arg0: i32) -> (i32, i32) {
    %c0_i32 = arith.constant 0 : i32
    %c0_i32_0 = arith.constant 0 : i32
    %c0_i32_1 = arith.constant 0 : i32
    return %c0_i32, %c0_i32_0 : i32, i32
  }
  func.func @transform_5(%arg0: i32) -> (i32, i32) {
    %c0_i32 = arith.constant 0 : i32
    %c0_i32_0 = arith.constant 0 : i32
    %c0_i32_1 = arith.constant 0 : i32
    return %c0_i32, %c0_i32_0 : i32, i32
  }
  func.func @transform_6(%arg0: i32) -> (i32, i32) {
    %c0_i32 = arith.constant 0 : i32
    %c0_i32_0 = arith.constant 0 : i32
    %c0_i32_1 = arith.constant 0 : i32
    return %c0_i32, %c0_i32_0 : i32, i32
  }
  func.func @transform_7(%arg0: i32) -> (i32, i32) {
    %c0_i32 = arith.constant 0 : i32
    %c0_i32_0 = arith.constant 0 : i32
    %c0_i32_1 = arith.constant 0 : i32
    return %c0_i32, %c0_i32_0 : i32, i32
  }
  func.func @transform_8(%arg0: i32) -> (i32, i32) {
    %c0_i32 = arith.constant 0 : i32
    %c0_i32_0 = arith.constant 0 : i32
    %c0_i32_1 = arith.constant 0 : i32
    return %c0_i32, %c0_i32_0 : i32, i32
  }
  func.func @transform_9(%arg0: i32) -> (i32, i32) {
    %c0_i32 = arith.constant 0 : i32
    %c0_i32_0 = arith.constant 0 : i32
    return %c0_i32, %arg0 : i32, i32
  }
}

</mosaic_0001>

<bundles_post_ra>
// kernel: feedforward_pallas.1
= control target key start
LH: loop header
LB: loop body
LE: loop exit
PB: predicated region body
PF: predicated region fallthrough
CT: control target
= control target key end

     0   :  { %vm78_vm0 = vcmask 130048   ;;  %v673_v2 = vmov 0   ;;  %vm256_vm1 = vcmask 261120   ;;  %s906_s0 = inlined_call_operand.vmem [shape: f32[10,16], index: 0, kind: input, shape index: {}]   ;;  %s907_s8 = inlined_call_operand.<no memory space> [shape: f32[1,1], index: 8, kind: input, shape index: {}]   ;;  %s908_s1 = inlined_call_operand.vmem [shape: f32[32,16], index: 1, kind: input, shape index: {}]   ;;  %s909_s2 = inlined_call_operand.vmem [shape: f32[32,1], index: 2, kind: input, shape index: {}]   ;;  %s910_s4 = inlined_call_operand.vmem [shape: f32[32,1], index: 4, kind: input, shape index: {}]   ;;  %s911_s6 = inlined_call_operand.vmem [shape: f32[32,1], index: 6, kind: input, shape index: {}]   ;;  %s912_s7 = inlined_call_operand.vmem [shape: f32[32,1], index: 7, kind: input, shape index: {}]   ;;  %s913_s3 = inlined_call_operand.vmem [shape: f32[32,32], index: 3, kind: input, shape index: {}]   ;;  %s914_s5 = inlined_call_operand.vmem [shape: f32[32,32], index: 5, kind: input, shape index: {}]   ;;  %s915_s9 = inlined_call_operand.vmem [shape: f32[1,128], index: 9, kind: output, shape index: {}]  }
   0x1   :  { %v57_v0 = vld [vmem:[%s906_s0 + $0x78] sm:$0xff]  ;;  %v56_v1 = vld [vmem:[%s906_s0 + $0x70] sm:$0xff]  ;;  %671 = vset.pattern.permute.xlu0 %v673_v2  ;;  %672 = vset.pattern.permute.xlu1 %v673_v2  ;;  %v14_v3 = vstv %s907_s8  ;;  %v55_v4 = vld [vmem:[%s906_s0 + $0x68] sm:$0xff] }
   0x2   :  { %604 = vmatprep.subr.msk.mxu0 %vm78_vm0, %v57_v0  ;;  %15 = vst [vmem:[#allocation2] sm:$0x1] %v14_v3  ;;  %v34_v5 = vld [vmem:[%s908_s1] sm:$0xff]  ;;  %v41_v6 = vld [vmem:[%s909_s2 + $0x18] sm:$0xff]  ;;  %v39_v7 = vld [vmem:[%s909_s2 + $0x8] sm:$0xff] }
   0x3   :  { %605 = vmatpush3.xpose.msk.msra.mxu0 %vm78_vm0, %v57_v0  ;;  %636 = vmatprep.mubr.msk.f32.mxu0 %vm78_vm0, %v34_v5  ;;  %v54_v8 = vld [vmem:[%s906_s0 + $0x60] sm:$0xff]  ;;  %v40_v9 = vld [vmem:[%s909_s2 + $0x10] sm:$0xff]  ;;  %v53_v11 = vld [vmem:[%s906_s0 + $0x58] sm:$0xff] }
   0x4   :  { %606 = vmatprep.subr.msk.mxu0 %vm78_vm0, %v56_v1  ;;  %75 = vperm.xlu0 %671, %v41_v6   ;;  %v38_v10 = vld [vmem:[%s909_s2] sm:$0xff]  ;;  %v235_v12 = vld [vmem:[%s910_s4 + $0x18] sm:$0xff]  ;;  %v234_v13 = vld [vmem:[%s910_s4 + $0x10] sm:$0xff] }
   0x5   :  { %65 = vperm.xlu1 %672, %v39_v7   ;;  %v52_v14 = vld [vmem:[%s906_s0 + $0x50] sm:$0xff]  ;;  %v233_v15 = vld [vmem:[%s910_s4 + $0x8] sm:$0xff]  ;;  %v232_v16 = vld [vmem:[%s910_s4] sm:$0xff] }
   0x6   :  { %v51_v17 = vld [vmem:[%s906_s0 + $0x48] sm:$0xff]  ;;  %v362_v18 = vld [vmem:[%s911_s6] sm:$0xff]  ;;  %v364_v21 = vld [vmem:[%s911_s6 + $0x10] sm:$0xff] }
   0x7   :  { %607 = vmatpush3.xpose.msk.msra.mxu0 %vm78_vm0, %v56_v1  ;;  %v363_v19 = vld [vmem:[%s911_s6 + $0x8] sm:$0xff]  ;;  %v50_v20 = vld [vmem:[%s906_s0 + $0x40] sm:$0xff]  ;;  %v365_v22 = vld [vmem:[%s911_s6 + $0x18] sm:$0xff] }
   0x8   :  { %608 = vmatprep.subr.msk.mxu0 %vm78_vm0, %v55_v4  ;;  %70 = vperm.xlu0 %671, %v40_v9   ;;  %v49_v23 = vld [vmem:[%s906_s0 + $0x38] sm:$0xff]  ;;  %v487_v24 = vld [vmem:[%s912_s7] sm:$0xff]  ;;  %v488_v25 = vld [vmem:[%s912_s7 + $0x8] sm:$0xff] }
   0x9   :  { %60 = vperm.xlu1 %672, %v38_v10   ;;  %v48_v26 = vld [vmem:[%s906_s0 + $0x30] sm:$0xff]  ;;  %v490_v28 = vld [vmem:[%s912_s7 + $0x18] sm:$0xff]  ;;  %v47_v29 = vld [vmem:[%s906_s0 + $0x28] sm:$0xff] }
   0xa   :  { %v489_v27 = vld [vmem:[%s912_s7 + $0x10] sm:$0xff]  ;;  %v491_v30 = vld [vmem:[#allocation2] sm:$0x1]  ;;  %v45_v32 = vld [vmem:[%s906_s0 + $0x18] sm:$0xff] }
   0xb   :  { %609 = vmatpush3.xpose.msk.msra.mxu0 %vm78_vm0, %v55_v4  ;;  %v46_v31 = vld [vmem:[%s906_s0 + $0x20] sm:$0xff]  ;;  %v44_v33 = vld [vmem:[%s906_s0 + $0x10] sm:$0xff]  ;;  %v43_v34 = vld [vmem:[%s906_s0 + $0x8] sm:$0xff] }
   0xc   :  { %610 = vmatprep.subr.msk.mxu0 %vm78_vm0, %v54_v8  ;;  %253 = vperm.xlu0 %671, %v235_v12   ;;  %v42_v35 = vld [vmem:[%s906_s0] sm:$0xff]  ;;  %v35_v36 = vld [vmem:[%s908_s1 + $0x8] sm:$0xff]  ;;  %v36_v37 = vld [vmem:[%s908_s1 + $0x10] sm:$0xff] }
   0xd   :  { %248 = vperm.xlu1 %672, %v234_v13   ;;  %v37_v38 = vld [vmem:[%s908_s1 + $0x18] sm:$0xff]  ;;  %v228_v39 = vld [vmem:[%s913_s3] sm:$0xff]  ;;  %v229_v56 = vld [vmem:[%s913_s3 + $0x8] sm:$0xff] }
   0xe   :  { %650 = vmatprep.mubr.msk.f32.mxu1 %vm256_vm1, %v228_v39  ;;  %v230_v57 = vld [vmem:[%s913_s3 + $0x10] sm:$0xff]  ;;  %v231_v58 = vld [vmem:[%s913_s3 + $0x18] sm:$0xff]  ;;  %v358_v59 = vld [vmem:[%s914_s5] sm:$0xff] }
   0xf   :  { %611 = vmatpush3.xpose.msk.msra.mxu0 %vm78_vm0, %v54_v8  ;;  %v359_v12 = vld [vmem:[%s914_s5 + $0x8] sm:$0xff]  ;;  %v360_v13 = vld [vmem:[%s914_s5 + $0x10] sm:$0xff] }
  0x10   :  { %612 = vmatprep.subr.msk.mxu0 %vm78_vm0, %v53_v11  ;;  %243 = vperm.xlu0 %671, %v233_v15  }
  0x11   :  { %238 = vperm.xlu1 %672, %v232_v16  }
  0x13   :  { %613 = vmatpush3.xpose.msk.msra.mxu0 %vm78_vm0, %v53_v11 }
  0x14   :  { %614 = vmatprep.subr.msk.mxu0 %vm78_vm0, %v52_v14  ;;  %368 = vperm.xlu0 %671, %v362_v18  }
  0x15   :  { %373 = vperm.xlu1 %672, %v363_v19  }
  0x17   :  { %615 = vmatpush3.xpose.msk.msra.mxu0 %vm78_vm0, %v52_v14  ;;  %v361_v14 = vld [vmem:[%s914_s5 + $0x18] sm:$0xff] }
  0x18   :  { %616 = vmatprep.subr.msk.mxu0 %vm78_vm0, %v51_v17  ;;  %378 = vperm.xlu0 %671, %v364_v21  }
  0x19   :  { %383 = vperm.xlu1 %672, %v365_v22  }
  0x1b   :  { %617 = vmatpush3.xpose.msk.msra.mxu0 %vm78_vm0, %v51_v17 }
  0x1c   :  { %618 = vmatprep.subr.msk.mxu0 %vm78_vm0, %v50_v20  ;;  %494 = vperm.xlu0 %671, %v487_v24  }
  0x1d   :  { %499 = vperm.xlu1 %672, %v488_v25  }
  0x1f   :  { %619 = vmatpush3.xpose.msk.msra.mxu0 %vm78_vm0, %v50_v20 }
  0x20   :  { %620 = vmatprep.subr.msk.mxu0 %vm78_vm0, %v49_v23  ;;  %504 = vperm.xlu0 %671, %v489_v27  }
  0x21   :  { %509 = vperm.xlu1 %672, %v490_v28  }
  0x23   :  { %621 = vmatpush3.xpose.msk.msra.mxu0 %vm78_vm0, %v49_v23 }
  0x24   :  { %622 = vmatprep.subr.msk.mxu0 %vm78_vm0, %v48_v26  ;;  %527 = vperm.xlu0 %671, %v491_v30  }
  0x27   :  { %623 = vmatpush3.xpose.msk.msra.mxu0 %vm78_vm0, %v48_v26 }
  0x28   :  { %624 = vmatprep.subr.msk.mxu0 %vm78_vm0, %v47_v29 }
  0x2b   :  { %625 = vmatpush3.xpose.msk.msra.mxu0 %vm78_vm0, %v47_v29 }
  0x2c   :  { %626 = vmatprep.subr.msk.mxu0 %vm78_vm0, %v46_v31 }
  0x2f   :  { %627 = vmatpush3.xpose.msk.msra.mxu0 %vm78_vm0, %v46_v31 }
  0x30   :  { %628 = vmatprep.subr.msk.mxu0 %vm78_vm0, %v45_v32 }
  0x33   :  { %629 = vmatpush3.xpose.msk.msra.mxu0 %vm78_vm0, %v45_v32 }
  0x34   :  { %630 = vmatprep.subr.msk.mxu0 %vm78_vm0, %v44_v33 }
  0x37   :  { %631 = vmatpush3.xpose.msk.msra.mxu0 %vm78_vm0, %v44_v33 }
  0x38   :  { %632 = vmatprep.subr.msk.mxu0 %vm78_vm0, %v43_v34 }
  0x3b   :  { %633 = vmatpush3.xpose.msk.msra.mxu0 %vm78_vm0, %v43_v34 }
  0x3c   :  { %634 = vmatprep.subr.msk.mxu0 %vm78_vm0, %v42_v35 }
  0x3f   :  { %635 = vmatpush3.xpose.msk.msra.mxu0 %vm78_vm0, %v42_v35 }
  0x42   :  { %637 = vmatmul.mubr.msk.f32.vlgmr.msra.gmra.mxu0 %vm78_vm0, %v35_v36 }
  0x43   :  { %639 = vmatprep.mubr.msk.f32.mxu0 %vm78_vm0, %v36_v37 }
  0x46   :  { %640 = vmatmul.mubr.msk.f32.gmra.mxu0 %vm78_vm0, %v37_v38 }
  0x7f   :  { %v76_v40 = vpop.permute.xlu0 %75 }
  0x80   :  { %v66_v42 = vpop.permute.xlu1 %65 }
  0x83   :  { %v71_v46 = vpop.permute.xlu0 %70 }
  0x84   :  { %v61_v51 = vpop.permute.xlu1 %60 }
  0x87   :  { %v254_v60 = vpop.permute.xlu0 %253 }
  0x88   :  { %v249_v62 = vpop.permute.xlu1 %248 }
  0x8b   :  { %v244_v2 = vpop.permute.xlu0 %243 }
  0x8c   :  { %v239_v7 = vpop.permute.xlu1 %238 }
  0x8f   :  { %v369_v15 = vpop.permute.xlu0 %368 }
  0x90   :  { %v374_v16 = vpop.permute.xlu1 %373 }
  0x93   :  { %v379_v17 = vpop.permute.xlu0 %378 }
  0x94   :  { %v384_v18 = vpop.permute.xlu1 %383 }
  0x97   :  { %v495_v23 = vpop.permute.xlu0 %494 }
  0x98   :  { %v500_v28 = vpop.permute.xlu1 %499 }
  0x9b   :  { %v505_v35 = vpop.permute.xlu0 %504 }
  0x9c   :  { %v510_v38 = vpop.permute.xlu1 %509 }
 0x102   :  { %v638_v41 = vpop.f32.mrf.mxu0 }
 0x103   :  { %v211_v48 = vadd.f32 %v638_v41, %v66_v42  ;;  %v530_v41 = vlaneseq }
 0x104   :  { %v205_v43 = vpop.f32.mrf.mxu0 }
 0x105   :  { %v206_v52 = vadd.f32 %v205_v43, %v61_v51  ;;  %v225_v54 = vmax.f32 %v211_v48, 0.0 }
 0x106   :  { %v641_v44 = vpop.f32.mrf.mxu0 }
 0x107   :  { %v221_v45 = vadd.f32 %v641_v44, %v76_v40  ;;  %v224_v55 = vmax.f32 %v206_v52, 0.0  ;;  %v531_v44 = vshrl.u32 %v530_v41, 7 }
 0x108   :  { %v215_v47 = vpop.f32.mrf.mxu0 }
 0x109   :  { %v227_v49 = vmax.f32 %v221_v45, 0.0  ;;  %v216_v50 = vadd.f32 %v215_v47, %v71_v46  ;;  %v532_v47 = vsub.s32 0, %v531_v44 }
 0x10b   :  { %v226_v53 = vmax.f32 %v216_v50, 0.0  ;;  %642 = vmatprep.subr.mxu1 %v227_v49 }
 0x10c   :  { %643 = vmatpush3.msra.mxu1 %v227_v49  ;;  %v528_v49 = vpop.permute.xlu0 %527 }
 0x10d   :  { %644 = vmatprep.subr.mxu1 %v226_v53  ;;  %v533_v51 = vrot.slane %v528_v49, %v532_v47 }
 0x10e   :  { %645 = vmatpush3.msra.mxu1 %v226_v53 }
 0x10f   :  { %646 = vmatprep.subr.mxu1 %v225_v54 }
 0x110   :  { %647 = vmatpush3.msra.mxu1 %v225_v54 }
 0x111   :  { %648 = vmatprep.subr.mxu1 %v224_v55 }
 0x112   :  { %649 = vmatpush3.msra.mxu1 %v224_v55 }
 0x113   :  { %651 = vmatmul.mubr.msk.f32.vlgmr.msra.gmra.mxu1 %vm256_vm1, %v229_v56 }
 0x114   :  { %653 = vmatprep.mubr.msk.f32.mxu1 %vm256_vm1, %v230_v57 }
 0x117   :  { %654 = vmatmul.mubr.msk.f32.gmra.mxu1 %vm256_vm1, %v231_v58 }
 0x118   :  { %664 = vmatprep.mubr.msk.f32.mxu1 %vm256_vm1, %v358_v59 }
 0x1d3   :  { %v652_v61 = vpop.f32.mrf.mxu1 }
 0x1d4   :  { %v341_v4 = vadd.f32 %v652_v61, %v244_v2 }
 0x1d5   :  { %v335_v63 = vpop.f32.mrf.mxu1 }
 0x1d6   :  { %v336_v8 = vadd.f32 %v335_v63, %v239_v7  ;;  %v355_v10 = vmax.f32 %v341_v4, 0.0 }
 0x1d7   :  { %v655_v0 = vpop.f32.mrf.mxu1 }
 0x1d8   :  { %v351_v1 = vadd.f32 %v655_v0, %v254_v60  ;;  %v354_v11 = vmax.f32 %v336_v8, 0.0 }
 0x1d9   :  { %v345_v3 = vpop.f32.mrf.mxu1 }
 0x1da   :  { %v357_v5 = vmax.f32 %v351_v1, 0.0  ;;  %v346_v6 = vadd.f32 %v345_v3, %v249_v62 }
 0x1dc   :  { %v356_v9 = vmax.f32 %v346_v6, 0.0  ;;  %656 = vmatprep.subr.mxu1 %v357_v5 }
 0x1dd   :  { %657 = vmatpush3.msra.mxu1 %v357_v5 }
 0x1de   :  { %658 = vmatprep.subr.mxu1 %v356_v9 }
 0x1df   :  { %659 = vmatpush3.msra.mxu1 %v356_v9 }
 0x1e0   :  { %660 = vmatprep.subr.mxu1 %v355_v10 }
 0x1e1   :  { %661 = vmatpush3.msra.mxu1 %v355_v10 }
 0x1e2   :  { %662 = vmatprep.subr.mxu1 %v354_v11 }
 0x1e3   :  { %663 = vmatpush3.msra.mxu1 %v354_v11 }
 0x1e4   :  { %665 = vmatmul.mubr.msk.f32.vlgmr.msra.gmra.mxu1 %vm256_vm1, %v359_v12 }
 0x1e5   :  { %667 = vmatprep.mubr.msk.f32.mxu1 %vm256_vm1, %v360_v13 }
 0x1e8   :  { %668 = vmatmul.mubr.msk.f32.gmra.mxu1 %vm256_vm1, %v361_v14 }
 0x2a4   :  { %v666_v19 = vpop.f32.mrf.mxu1 }
 0x2a5   :  { %v470_v20 = vadd.f32 %v666_v19, %v374_v16 }
 0x2a6   :  { %v464_v21 = vpop.f32.mrf.mxu1 }
 0x2a7   :  { %v465_v22 = vadd.f32 %v464_v21, %v369_v15  ;;  %v484_v25 = vmax.f32 %v470_v20, 0.0 }
 0x2a8   :  { %v669_v24 = vpop.f32.mrf.mxu1 }
 0x2a9   :  { %v483_v26 = vmax.f32 %v465_v22, 0.0  ;;  %v480_v27 = vadd.f32 %v669_v24, %v384_v18  ;;  %v513_v32 = vmul.f32 %v500_v28, %v484_v25 }
 0x2aa   :  { %v474_v29 = vpop.f32.mrf.mxu1 }
 0x2ab   :  { %v512_v30 = vmul.f32 %v495_v23, %v483_v26  ;;  %v475_v31 = vadd.f32 %v474_v29, %v379_v17  ;;  %v486_v33 = vmax.f32 %v480_v27, 0.0 }
 0x2ad   :  { %v485_v34 = vmax.f32 %v475_v31, 0.0  ;;  %v516_v36 = vadd.f32 %v513_v32, %v512_v30  ;;  %v515_v39 = vmul.f32 %v510_v38, %v486_v33 }
 0x2af   :  { %v514_v37 = vmul.f32 %v505_v35, %v485_v34 }
 0x2b1   :  { %v517_v40 = vadd.f32 %v516_v36, %v514_v37 }
 0x2b3   :  { %v518_v42 = vadd.f32 %v517_v40, %v515_v39 }
 0x2b5   :  { %v519_v43 = vrot.slane %v518_v42, 4 }
 0x2b7   :  { %v520_v45 = vadd.f32 %v519_v43, %v518_v42 }
 0x2b9   :  { %v521_v46 = vrot.slane %v520_v45, 2 }
 0x2bb   :  { %v522_v48 = vadd.f32 %v521_v46, %v520_v45 }
 0x2bd   :  { %v523_v50 = vrot.slane %v522_v48, 1 }
 0x2bf   :  { %v524_v52 = vadd.f32 %v523_v50, %v522_v48 }
 0x2c1   :  { %v534_v53 = vadd.f32 %v533_v51, %v524_v52 }
 0x2c3   :  { %535 = vst [vmem:[%s915_s9] sm:$0x1] %v534_v53 }

</bundles_post_ra>
